<compile_context>
chip_gen: v7x
topology: tpu7x:2x2x1
jax: 0.10.0
libtpu: 0.0.40
codegen_flags: <defaults>
</compile_context>

<pallas_src>
import functools
import math

import jax
import jax.numpy as jnp
from jax.experimental import pallas as pl
from jax.experimental.pallas import tpu as pltpu


# ----------------------------------------------------------------------------
# Kernel: one transformer block per grid step; grid = (batch, block_index).
# The output block (same (b,0,0) tile across the block axis) carries the
# running activation in VMEM for the whole stack.
# ----------------------------------------------------------------------------
def transformer_stack_kernel(
    x_ref,                                   # (1, S, D)  f32 input activations
    wqkv_ref, bqkv_ref,                      # (1, D, 3D) bf16, (1, 1, 3D) f32
    wo_ref, bo_ref,                          # (1, D, D)  bf16, (1, 1, D)  f32
    g1_ref, be1_ref,                         # (1, 1, D)  f32  LayerNorm 1
    w1_ref, b1_ref,                          # (1, D, 4D) bf16, (1, 1, 4D) f32
    w2_ref, b2_ref,                          # (1, 4D, D) bf16, (1, 1, D)  f32
    g2_ref, be2_ref,                         # (1, 1, D)  f32  LayerNorm 2
    o_ref,                                   # (1, S, D)  f32  resident activation
    *, n_heads: int,
):
    blk = pl.program_id(1)

    # First block of this batch element: seed the resident activation from x.
    @pl.when(blk == 0)
    def _():
        o_ref[...] = x_ref[...]

    x = o_ref[0]                             # (S, D) f32, current activation
    S, D = x.shape
    H = n_heads
    Dh = D // H
    scale = 1.0 / math.sqrt(Dh)
    bf16 = jnp.bfloat16

    def matmul(a_f32, w_ref, b_ref):
        # bf16 MXU operands, f32 accumulation, f32 bias add.
        return (
            jnp.dot(a_f32.astype(bf16), w_ref[0],
                    preferred_element_type=jnp.float32)
            + b_ref[0]
        )

    def layer_norm(v, g_ref, b_ref):
        mu = jnp.mean(v, axis=-1, keepdims=True)
        var = jnp.mean(jnp.square(v - mu), axis=-1, keepdims=True)  # biased (PyTorch LN)
        return (v - mu) * jax.lax.rsqrt(var + 1e-5) * g_ref[0] + b_ref[0]

    # --- multi-head self-attention (fused QKV, head-batched einsum) ----------
    qkv = matmul(x, wqkv_ref, bqkv_ref)                     # (S, 3D) f32
    q = jnp.transpose(qkv[:, 0 * D:1 * D].reshape(S, H, Dh), (1, 0, 2))  # (H,S,Dh)
    k = jnp.transpose(qkv[:, 1 * D:2 * D].reshape(S, H, Dh), (1, 0, 2))
    v = jnp.transpose(qkv[:, 2 * D:3 * D].reshape(S, H, Dh), (1, 0, 2))

    s = jnp.einsum("hqd,hkd->hqk", q.astype(bf16), k.astype(bf16),
                   preferred_element_type=jnp.float32) * scale          # (H,S,S) f32
    s = s - jnp.max(s, axis=-1, keepdims=True)
    p = jnp.exp(s)
    p = p * pl.reciprocal(jnp.sum(p, axis=-1, keepdims=True), approx=True)
    ctx = jnp.einsum("hqk,hkd->hqd", p.astype(bf16), v.astype(bf16),
                     preferred_element_type=jnp.float32)                # (H,S,Dh)
    ctx = jnp.transpose(ctx, (1, 0, 2)).reshape(S, D)                   # (S, D)

    attn_out = matmul(ctx, wo_ref, bo_ref)                              # (S, D)

    # --- residual + LN 1 ------------------------------------------------------
    y = layer_norm(x + attn_out, g1_ref, be1_ref)

    # --- feed-forward (ReLU, 4x hidden) --------------------------------------
    hidden = jnp.maximum(matmul(y, w1_ref, b1_ref), 0.0)                # (S, 4D)
    ff = matmul(hidden, w2_ref, b2_ref)                                 # (S, D)

    # --- residual + LN 2 -> update resident activation ------------------------
    o_ref[0] = layer_norm(y + ff, g2_ref, be2_ref)


# ----------------------------------------------------------------------------
# Wrapper: single pallas_call over the whole stack.
# ----------------------------------------------------------------------------
_PARAM_ORDER = ("wqkv", "bqkv", "wo", "bo", "g1", "be1",
                "w1", "b1", "w2", "b2", "g2", "be2")


def _vmem_limit_bytes(S, D, H, plist, n_blocks):
    f32 = 4
    act = S * D * f32
    per_block_params = sum(int(p.nbytes) // n_blocks for p in plist)
    work = (6 * act                       # x, y, residuals, ctx, attn_out
            + 2 * S * 3 * D * f32         # qkv (f32 + bf16 copies)
            + 3 * H * S * S * f32         # scores / exp / probs
            + 2 * S * 4 * D * f32)        # FFN hidden (f32 + bf16 copy)
    # inputs are double-buffered by the pipeline; output block is resident.
    total = 2 * (per_block_params + act) + act + work + (2 << 20)
    return int(min(max(total, 8 << 20), 64 << 20))


def model_forward(x, stacked_params, n_heads):
    B, S, D = x.shape
    plist = [stacked_params[name] for name in _PARAM_ORDER]
    n_blocks = plist[0].shape[0]

    in_specs = [pl.BlockSpec((1, S, D), lambda b, l: (b, 0, 0))]
    for p in plist:
        # one block's worth of each (stacked) weight, indexed by the block id.
        in_specs.append(pl.BlockSpec((1,) + p.shape[1:], lambda b, l: (l, 0, 0)))

    return pl.pallas_call(
        functools.partial(transformer_stack_kernel, n_heads=n_heads),
        out_shape=jax.ShapeDtypeStruct((B, S, D), jnp.float32),
        grid=(B, n_blocks),
        in_specs=in_specs,
        out_specs=pl.BlockSpec((1, S, D), lambda b, l: (b, 0, 0)),
        compiler_params=pltpu.CompilerParams(
            dimension_semantics=("parallel", "arbitrary"),
            vmem_limit_bytes=_vmem_limit_bytes(S, D, n_heads, plist, n_blocks)),
    )(x, *plist)


# ----------------------------------------------------------------------------
# Deterministic parameter init (synthetic weights, stacked over blocks).
# Weight matrices stored as bf16 (MXU operands); biases / LN params in f32.
# ----------------------------------------------------------------------------
def init_stacked_params(key, n_blocks, n_features):
    D = n_features
    ks = jax.random.split(key, 4)
    std = 0.02

    def w(k, shape):
        return (std * jax.random.normal(k, (n_blocks,) + shape, jnp.float32)
                ).astype(jnp.bfloat16)

    def zeros(shape):
        return jnp.zeros((n_blocks,) + shape, jnp.float32)

    def ones(shape):
        return jnp.ones((n_blocks,) + shape, jnp.float32)

    return dict(
        wqkv=w(ks[0], (D, 3 * D)),
        bqkv=zeros((1, 3 * D)),
        wo=w(ks[1], (D, D)),
        bo=zeros((1, D)),
        g1=ones((1, D)),
        be1=zeros((1, D)),
        w1=w(ks[2], (D, 4 * D)),
        b1=zeros((1, 4 * D)),
        w2=w(ks[3], (4 * D, D)),
        b2=zeros((1, D)),
        g2=ones((1, D)),
        be2=zeros((1, D)),
    )


if __name__ == "__main__":
    # small shapes consistent with the module: (batch, seq, n_features)
    batch, seq, n_features, n_heads, n_blocks = 2, 8, 32, 4, 2

    root = jax.random.PRNGKey(0)
    kx, kp = jax.random.split(root)
    x = jax.random.normal(kx, (batch, seq, n_features), jnp.float32)
    params = init_stacked_params(kp, n_blocks, n_features)

    out = model_forward(x, params, n_heads)
    out = jax.block_until_ready(out)
    assert out.shape == (batch, seq, n_features)
    assert bool(jnp.all(jnp.isfinite(out)))
    print("KERNEL_OK")
</pallas_src>

<mosaic_0001>
module attributes {stable_mosaic.version = 11 : i64} {
  func.func @transformer_stack_kernel(%arg0: i32, %arg1: i32, %arg2: memref<1x8x32xf32, #tpu.memory_space<vmem>>, %arg3: memref<1x32x96xbf16, #tpu.memory_space<vmem>>, %arg4: memref<1x1x96xf32, #tpu.memory_space<vmem>>, %arg5: memref<1x32x32xbf16, #tpu.memory_space<vmem>>, %arg6: memref<1x1x32xf32, #tpu.memory_space<vmem>>, %arg7: memref<1x1x32xf32, #tpu.memory_space<vmem>>, %arg8: memref<1x1x32xf32, #tpu.memory_space<vmem>>, %arg9: memref<1x32x128xbf16, #tpu.memory_space<vmem>>, %arg10: memref<1x1x128xf32, #tpu.memory_space<vmem>>, %arg11: memref<1x128x32xbf16, #tpu.memory_space<vmem>>, %arg12: memref<1x1x32xf32, #tpu.memory_space<vmem>>, %arg13: memref<1x1x32xf32, #tpu.memory_space<vmem>>, %arg14: memref<1x1x32xf32, #tpu.memory_space<vmem>>, %arg15: memref<1x8x32xf32, #tpu.memory_space<vmem>>) attributes {dimension_semantics = [#tpu.dimension_semantics<parallel>, #tpu.dimension_semantics<arbitrary>], iteration_bounds = array<i64: 2, 2>, scalar_prefetch = 0 : i64, scratch_operands = 0 : i64, tpu.core_type = #tpu.core_type<tc>, window_params = [{transform_indices = @transform_0, window_bounds = array<i64: 1, 8, 32>}, {transform_indices = @transform_1, window_bounds = array<i64: 1, 32, 96>}, {transform_indices = @transform_2, window_bounds = array<i64: 1, 1, 96>}, {transform_indices = @transform_3, window_bounds = array<i64: 1, 32, 32>}, {transform_indices = @transform_4, window_bounds = array<i64: 1, 1, 32>}, {transform_indices = @transform_5, window_bounds = array<i64: 1, 1, 32>}, {transform_indices = @transform_6, window_bounds = array<i64: 1, 1, 32>}, {transform_indices = @transform_7, window_bounds = array<i64: 1, 32, 128>}, {transform_indices = @transform_8, window_bounds = array<i64: 1, 1, 128>}, {transform_indices = @transform_9, window_bounds = array<i64: 1, 128, 32>}, {transform_indices = @transform_10, window_bounds = array<i64: 1, 1, 32>}, {transform_indices = @transform_11, window_bounds = array<i64: 1, 1, 32>}, {transform_indices = @transform_12, window_bounds = array<i64: 1, 1, 32>}, {transform_indices = @transform_13, window_bounds = array<i64: 1, 8, 32>}]} {
    %c0_i32 = arith.constant 0 : i32
    %0 = arith.cmpi eq, %arg1, %c0_i32 : i32
    %1 = arith.extui %0 : i1 to i32
    %c0_i32_0 = arith.constant 0 : i32
    %2 = arith.cmpi ne, %1, %c0_i32_0 : i32
    scf.if %2 {
      %c0_61 = arith.constant 0 : index
      %c0_62 = arith.constant 0 : index
      %c0_63 = arith.constant 0 : index
      %125 = vector.load %arg2[%c0_61, %c0_62, %c0_63] : memref<1x8x32xf32, #tpu.memory_space<vmem>>, vector<1x8x32xf32>
      %c0_64 = arith.constant 0 : index
      %c0_65 = arith.constant 0 : index
      %c0_66 = arith.constant 0 : index
      %126 = vector.load %arg15[%c0_64, %c0_65, %c0_66] : memref<1x8x32xf32, #tpu.memory_space<vmem>>, vector<1x8x32xf32>
      tpu.vector_store %arg15[%c0_64, %c0_65, %c0_66], %125 {strides = array<i32>} : memref<1x8x32xf32, #tpu.memory_space<vmem>>, vector<1x8x32xf32>,
    } else {
    }
    %c0 = arith.constant 0 : index
    %c0_1 = arith.constant 0 : index
    %c0_2 = arith.constant 0 : index
    %3 = vector.load %arg15[%c0, %c0_1, %c0_2] : memref<1x8x32xf32, #tpu.memory_space<vmem>>, vector<1x8x32xf32>
    %4 = vector.shape_cast %3 : vector<1x8x32xf32> to vector<8x32xf32>
    %5 = arith.truncf %4 : vector<8x32xf32> to vector<8x32xbf16>
    %c0_3 = arith.constant 0 : index
    %c0_4 = arith.constant 0 : index
    %c0_5 = arith.constant 0 : index
    %6 = vector.load %arg3[%c0_3, %c0_4, %c0_5] : memref<1x32x96xbf16, #tpu.memory_space<vmem>>, vector<1x32x96xbf16>
    %7 = vector.shape_cast %6 : vector<1x32x96xbf16> to vector<32x96xbf16>
    %cst = arith.constant dense<0.000000e+00> : vector<8x96xf32>
    %8 = tpu.matmul %5, %7, %cst {dimension_numbers = #tpu.dot_dimension_numbers<[1], [0], [0], [1], [0, 0, 1, 1], [], []>} : vector<8x32xbf16>, vector<32x96xbf16>, vector<8x96xf32> -> vector<8x96xf32>
    %c0_6 = arith.constant 0 : index
    %c0_7 = arith.constant 0 : index
    %c0_8 = arith.constant 0 : index
    %9 = vector.load %arg4[%c0_6, %c0_7, %c0_8] : memref<1x1x96xf32, #tpu.memory_space<vmem>>, vector<1x1x96xf32>
    %10 = vector.shape_cast %9 : vector<1x1x96xf32> to vector<1x96xf32>
    %11 = vector.broadcast %10 : vector<1x96xf32> to vector<8x96xf32>
    %12 = arith.addf %8, %11 : vector<8x96xf32>
    %13 = vector.extract_strided_slice %12 {offsets = [0, 0], sizes = [8, 32], strides = [1, 1]} : vector<8x96xf32> to vector<8x32xf32>
    %14 = vector.shape_cast %13 : vector<8x32xf32> to vector<8x4x8xf32>
    %15 = tpu.transpose %14, [1, 0, 2] : vector<8x4x8xf32> -> vector<4x8x8xf32>
    %16 = vector.extract_strided_slice %12 {offsets = [0, 32], sizes = [8, 32], strides = [1, 1]} : vector<8x96xf32> to vector<8x32xf32>
    %17 = vector.shape_cast %16 : vector<8x32xf32> to vector<8x4x8xf32>
    %18 = tpu.transpose %17, [1, 0, 2] : vector<8x4x8xf32> -> vector<4x8x8xf32>
    %19 = vector.extract_strided_slice %12 {offsets = [0, 64], sizes = [8, 32], strides = [1, 1]} : vector<8x96xf32> to vector<8x32xf32>
    %20 = vector.shape_cast %19 : vector<8x32xf32> to vector<8x4x8xf32>
    %21 = tpu.transpose %20, [1, 0, 2] : vector<8x4x8xf32> -> vector<4x8x8xf32>
    %22 = arith.truncf %15 : vector<4x8x8xf32> to vector<4x8x8xbf16>
    %23 = arith.truncf %18 : vector<4x8x8xf32> to vector<4x8x8xbf16>
    "tpu.trace_start"() <{level = 10 : i32, message = "hqd,hkd->hqk"}> : () -> ()
    %cst_9 = arith.constant dense<0.000000e+00> : vector<4x8x8xf32>
    %24 = tpu.matmul %22, %23, %cst_9 {dimension_numbers = #tpu.dot_dimension_numbers<[2], [2], [1], [1], [0, 0, 0, 1, 1, 1], [0], [0]>} : vector<4x8x8xbf16>, vector<4x8x8xbf16>, vector<4x8x8xf32> -> vector<4x8x8xf32>
    "tpu.trace_stop"() : () -> ()
    %cst_10 = arith.constant 0.353553385 : f32
    %25 = vector.broadcast %cst_10 : f32 to vector<4x8x8xf32>
    %26 = arith.mulf %24, %25 : vector<4x8x8xf32>
    %cst_11 = arith.constant dense<0xFF800000> : vector<4x8xf32>
    %27 = vector.multi_reduction <maximumf>, %26, %cst_11 [2] : vector<4x8x8xf32> to vector<4x8xf32>
    %28 = vector.shape_cast %27 : vector<4x8xf32> to vector<4x8x1xf32>
    %29 = vector.broadcast %28 : vector<4x8x1xf32> to vector<4x8x8xf32>
    %30 = arith.subf %26, %29 : vector<4x8x8xf32>
    %31 = math.exp %30 : vector<4x8x8xf32>
    %cst_12 = arith.constant dense<0.000000e+00> : vector<4x8xf32>
    %32 = vector.multi_reduction <add>, %31, %cst_12 [2] : vector<4x8x8xf32> to vector<4x8xf32>
    %33 = vector.shape_cast %32 : vector<4x8xf32> to vector<4x8x1xf32>
    %34 = tpu.reciprocal %33 {approx = true} : vector<4x8x1xf32> -> vector<4x8x1xf32>
    %35 = vector.broadcast %34 : vector<4x8x1xf32> to vector<4x8x8xf32>
    %36 = arith.mulf %31, %35 : vector<4x8x8xf32>
    %37 = arith.truncf %36 : vector<4x8x8xf32> to vector<4x8x8xbf16>
    %38 = arith.truncf %21 : vector<4x8x8xf32> to vector<4x8x8xbf16>
    "tpu.trace_start"() <{level = 10 : i32, message = "hqk,hkd->hqd"}> : () -> ()
    %cst_13 = arith.constant dense<0.000000e+00> : vector<4x8x8xf32>
    %39 = tpu.matmul %37, %38, %cst_13 {dimension_numbers = #tpu.dot_dimension_numbers<[2], [1], [1], [2], [0, 0, 0, 1, 1, 2], [0], [0]>} : vector<4x8x8xbf16>, vector<4x8x8xbf16>, vector<4x8x8xf32> -> vector<4x8x8xf32>
    "tpu.trace_stop"() : () -> ()
    %40 = tpu.transpose %39, [1, 0, 2] : vector<4x8x8xf32> -> vector<8x4x8xf32>
    %41 = vector.shape_cast %40 : vector<8x4x8xf32> to vector<8x32xf32>
    %42 = arith.truncf %41 : vector<8x32xf32> to vector<8x32xbf16>
    %c0_14 = arith.constant 0 : index
    %c0_15 = arith.constant 0 : index
    %c0_16 = arith.constant 0 : index
    %43 = vector.load %arg5[%c0_14, %c0_15, %c0_16] : memref<1x32x32xbf16, #tpu.memory_space<vmem>>, vector<1x32x32xbf16>
    %44 = vector.shape_cast %43 : vector<1x32x32xbf16> to vector<32x32xbf16>
    %cst_17 = arith.constant dense<0.000000e+00> : vector<8x32xf32>
    %45 = tpu.matmul %42, %44, %cst_17 {dimension_numbers = #tpu.dot_dimension_numbers<[1], [0], [0], [1], [0, 0, 1, 1], [], []>} : vector<8x32xbf16>, vector<32x32xbf16>, vector<8x32xf32> -> vector<8x32xf32>
    %c0_18 = arith.constant 0 : index
    %c0_19 = arith.constant 0 : index
    %c0_20 = arith.constant 0 : index
    %46 = vector.load %arg6[%c0_18, %c0_19, %c0_20] : memref<1x1x32xf32, #tpu.memory_space<vmem>>, vector<1x1x32xf32>
    %47 = vector.shape_cast %46 : vector<1x1x32xf32> to vector<1x32xf32>
    %48 = vector.broadcast %47 : vector<1x32xf32> to vector<8x32xf32>
    %49 = arith.addf %45, %48 : vector<8x32xf32>
    %50 = arith.addf %4, %49 : vector<8x32xf32>
    %cst_21 = arith.constant dense<0.000000e+00> : vector<8xf32>
    %51 = vector.multi_reduction <add>, %50, %cst_21 [1] : vector<8x32xf32> to vector<8xf32>
    %52 = vector.shape_cast %51 : vector<8xf32> to vector<8x1xf32>
    %cst_22 = arith.constant 3.200000e+01 : f32
    %53 = vector.broadcast %cst_22 : f32 to vector<8x1xf32>
    %54 = arith.divf %52, %53 : vector<8x1xf32>
    %55 = vector.broadcast %54 : vector<8x1xf32> to vector<8x32xf32>
    %56 = arith.subf %50, %55 : vector<8x32xf32>
    %57 = arith.mulf %56, %56 : vector<8x32xf32>
    %cst_23 = arith.constant dense<0.000000e+00> : vector<8xf32>
    %58 = vector.multi_reduction <add>, %57, %cst_23 [1] : vector<8x32xf32> to vector<8xf32>
    %59 = vector.shape_cast %58 : vector<8xf32> to vector<8x1xf32>
    %cst_24 = arith.constant 3.200000e+01 : f32
    %60 = vector.broadcast %cst_24 : f32 to vector<8x1xf32>
    %61 = arith.divf %59, %60 : vector<8x1xf32>
    %62 = vector.broadcast %54 : vector<8x1xf32> to vector<8x32xf32>
    %63 = arith.subf %50, %62 : vector<8x32xf32>
    %cst_25 = arith.constant 9.99999974E-6 : f32
    %64 = vector.broadcast %cst_25 : f32 to vector<8x1xf32>
    %65 = arith.addf %61, %64 : vector<8x1xf32>
    %66 = math.rsqrt %65 : vector<8x1xf32>
    %67 = vector.broadcast %66 : vector<8x1xf32> to vector<8x32xf32>
    %68 = arith.mulf %63, %67 : vector<8x32xf32>
    %c0_26 = arith.constant 0 : index
    %c0_27 = arith.constant 0 : index
    %c0_28 = arith.constant 0 : index
    %69 = vector.load %arg7[%c0_26, %c0_27, %c0_28] : memref<1x1x32xf32, #tpu.memory_space<vmem>>, vector<1x1x32xf32>
    %70 = vector.shape_cast %69 : vector<1x1x32xf32> to vector<1x32xf32>
    %71 = vector.broadcast %70 : vector<1x32xf32> to vector<8x32xf32>
    %72 = arith.mulf %68, %71 : vector<8x32xf32>
    %c0_29 = arith.constant 0 : index
    %c0_30 = arith.constant 0 : index
    %c0_31 = arith.constant 0 : index
    %73 = vector.load %arg8[%c0_29, %c0_30, %c0_31] : memref<1x1x32xf32, #tpu.memory_space<vmem>>, vector<1x1x32xf32>
    %74 = vector.shape_cast %73 : vector<1x1x32xf32> to vector<1x32xf32>
    %75 = vector.broadcast %74 : vector<1x32xf32> to vector<8x32xf32>
    %76 = arith.addf %72, %75 : vector<8x32xf32>
    %77 = arith.truncf %76 : vector<8x32xf32> to vector<8x32xbf16>
    %c0_32 = arith.constant 0 : index
    %c0_33 = arith.constant 0 : index
    %c0_34 = arith.constant 0 : index
    %78 = vector.load %arg9[%c0_32, %c0_33, %c0_34] : memref<1x32x128xbf16, #tpu.memory_space<vmem>>, vector<1x32x128xbf16>
    %79 = vector.shape_cast %78 : vector<1x32x128xbf16> to vector<32x128xbf16>
    %cst_35 = arith.constant dense<0.000000e+00> : vector<8x128xf32>
    %80 = tpu.matmul %77, %79, %cst_35 {dimension_numbers = #tpu.dot_dimension_numbers<[1], [0], [0], [1], [0, 0, 1, 1], [], []>} : vector<8x32xbf16>, vector<32x128xbf16>, vector<8x128xf32> -> vector<8x128xf32>
    %c0_36 = arith.constant 0 : index
    %c0_37 = arith.constant 0 : index
    %c0_38 = arith.constant 0 : index
    %81 = vector.load %arg10[%c0_36, %c0_37, %c0_38] : memref<1x1x128xf32, #tpu.memory_space<vmem>>, vector<1x1x128xf32>
    %82 = vector.shape_cast %81 : vector<1x1x128xf32> to vector<1x128xf32>
    %83 = vector.broadcast %82 : vector<1x128xf32> to vector<8x128xf32>
    %84 = arith.addf %80, %83 : vector<8x128xf32>
    %cst_39 = arith.constant 0.000000e+00 : f32
    %85 = vector.broadcast %cst_39 : f32 to vector<8x128xf32>
    %86 = arith.maximumf %84, %85 : vector<8x128xf32>
    %87 = arith.truncf %86 : vector<8x128xf32> to vector<8x128xbf16>
    %c0_40 = arith.constant 0 : index
    %c0_41 = arith.constant 0 : index
    %c0_42 = arith.constant 0 : index
    %88 = vector.load %arg11[%c0_40, %c0_41, %c0_42] : memref<1x128x32xbf16, #tpu.memory_space<vmem>>, vector<1x128x32xbf16>
    %89 = vector.shape_cast %88 : vector<1x128x32xbf16> to vector<128x32xbf16>
    %cst_43 = arith.constant dense<0.000000e+00> : vector<8x32xf32>
    %90 = tpu.matmul %87, %89, %cst_43 {dimension_numbers = #tpu.dot_dimension_numbers<[1], [0], [0], [1], [0, 0, 1, 1], [], []>} : vector<8x128xbf16>, vector<128x32xbf16>, vector<8x32xf32> -> vector<8x32xf32>
    %c0_44 = arith.constant 0 : index
    %c0_45 = arith.constant 0 : index
    %c0_46 = arith.constant 0 : index
    %91 = vector.load %arg12[%c0_44, %c0_45, %c0_46] : memref<1x1x32xf32, #tpu.memory_space<vmem>>, vector<1x1x32xf32>
    %92 = vector.shape_cast %91 : vector<1x1x32xf32> to vector<1x32xf32>
    %93 = vector.broadcast %92 : vector<1x32xf32> to vector<8x32xf32>
    %94 = arith.addf %90, %93 : vector<8x32xf32>
    %95 = arith.addf %76, %94 : vector<8x32xf32>
    %cst_47 = arith.constant dense<0.000000e+00> : vector<8xf32>
    %96 = vector.multi_reduction <add>, %95, %cst_47 [1] : vector<8x32xf32> to vector<8xf32>
    %97 = vector.shape_cast %96 : vector<8xf32> to vector<8x1xf32>
    %cst_48 = arith.constant 3.200000e+01 : f32
    %98 = vector.broadcast %cst_48 : f32 to vector<8x1xf32>
    %99 = arith.divf %97, %98 : vector<8x1xf32>
    %100 = vector.broadcast %99 : vector<8x1xf32> to vector<8x32xf32>
    %101 = arith.subf %95, %100 : vector<8x32xf32>
    %102 = arith.mulf %101, %101 : vector<8x32xf32>
    %cst_49 = arith.constant dense<0.000000e+00> : vector<8xf32>
    %103 = vector.multi_reduction <add>, %102, %cst_49 [1] : vector<8x32xf32> to vector<8xf32>
    %104 = vector.shape_cast %103 : vector<8xf32> to vector<8x1xf32>
    %cst_50 = arith.constant 3.200000e+01 : f32
    %105 = vector.broadcast %cst_50 : f32 to vector<8x1xf32>
    %106 = arith.divf %104, %105 : vector<8x1xf32>
    %107 = vector.broadcast %99 : vector<8x1xf32> to vector<8x32xf32>
    %108 = arith.subf %95, %107 : vector<8x32xf32>
    %cst_51 = arith.constant 9.99999974E-6 : f32
    %109 = vector.broadcast %cst_51 : f32 to vector<8x1xf32>
    %110 = arith.addf %106, %109 : vector<8x1xf32>
    %111 = math.rsqrt %110 : vector<8x1xf32>
    %112 = vector.broadcast %111 : vector<8x1xf32> to vector<8x32xf32>
    %113 = arith.mulf %108, %112 : vector<8x32xf32>
    %c0_52 = arith.constant 0 : index
    %c0_53 = arith.constant 0 : index
    %c0_54 = arith.constant 0 : index
    %114 = vector.load %arg13[%c0_52, %c0_53, %c0_54] : memref<1x1x32xf32, #tpu.memory_space<vmem>>, vector<1x1x32xf32>
    %115 = vector.shape_cast %114 : vector<1x1x32xf32> to vector<1x32xf32>
    %116 = vector.broadcast %115 : vector<1x32xf32> to vector<8x32xf32>
    %117 = arith.mulf %113, %116 : vector<8x32xf32>
    %c0_55 = arith.constant 0 : index
    %c0_56 = arith.constant 0 : index
    %c0_57 = arith.constant 0 : index
    %118 = vector.load %arg14[%c0_55, %c0_56, %c0_57] : memref<1x1x32xf32, #tpu.memory_space<vmem>>, vector<1x1x32xf32>
    %119 = vector.shape_cast %118 : vector<1x1x32xf32> to vector<1x32xf32>
    %120 = vector.broadcast %119 : vector<1x32xf32> to vector<8x32xf32>
    %121 = arith.addf %117, %120 : vector<8x32xf32>
    %c0_58 = arith.constant 0 : index
    %c0_59 = arith.constant 0 : index
    %c0_60 = arith.constant 0 : index
    %122 = vector.load %arg15[%c0_58, %c0_59, %c0_60] : memref<1x8x32xf32, #tpu.memory_space<vmem>>, vector<1x8x32xf32>
    %123 = vector.shape_cast %122 : vector<1x8x32xf32> to vector<8x32xf32>
    %124 = vector.shape_cast %121 : vector<8x32xf32> to vector<1x8x32xf32>
    tpu.vector_store %arg15[%c0_58, %c0_59, %c0_60], %124 {strides = array<i32>} : memref<1x8x32xf32, #tpu.memory_space<vmem>>, vector<1x8x32xf32>,
    return
  }
  func.func @transform_0(%arg0: i32, %arg1: i32) -> (i32, i32, i32) {
    %c0_i32 = arith.constant 0 : i32
    %c0_i32_0 = arith.constant 0 : i32
    %c0_i32_1 = arith.constant 0 : i32
    return %arg0, %c0_i32, %c0_i32_0 : i32, i32, i32
  }
  func.func @transform_1(%arg0: i32, %arg1: i32) -> (i32, i32, i32) {
    %c0_i32 = arith.constant 0 : i32
    %c0_i32_0 = arith.constant 0 : i32
    %c0_i32_1 = arith.constant 0 : i32
    return %arg1, %c0_i32, %c0_i32_0 : i32, i32, i32
  }
  func.func @transform_2(%arg0: i32, %arg1: i32) -> (i32, i32, i32) {
    %c0_i32 = arith.constant 0 : i32
    %c0_i32_0 = arith.constant 0 : i32
    %c0_i32_1 = arith.constant 0 : i32
    return %arg1, %c0_i32, %c0_i32_0 : i32, i32, i32
  }
  func.func @transform_3(%arg0: i32, %arg1: i32) -> (i32, i32, i32) {
    %c0_i32 = arith.constant 0 : i32
    %c0_i32_0 = arith.constant 0 : i32
    %c0_i32_1 = arith.constant 0 : i32
    return %arg1, %c0_i32, %c0_i32_0 : i32, i32, i32
  }
  func.func @transform_4(%arg0: i32, %arg1: i32) -> (i32, i32, i32) {
    %c0_i32 = arith.constant 0 : i32
    %c0_i32_0 = arith.constant 0 : i32
    %c0_i32_1 = arith.constant 0 : i32
    return %arg1, %c0_i32, %c0_i32_0 : i32, i32, i32
  }
  func.func @transform_5(%arg0: i32, %arg1: i32) -> (i32, i32, i32) {
    %c0_i32 = arith.constant 0 : i32
    %c0_i32_0 = arith.constant 0 : i32
    %c0_i32_1 = arith.constant 0 : i32
    return %arg1, %c0_i32, %c0_i32_0 : i32, i32, i32
  }
  func.func @transform_6(%arg0: i32, %arg1: i32) -> (i32, i32, i32) {
    %c0_i32 = arith.constant 0 : i32
    %c0_i32_0 = arith.constant 0 : i32
    %c0_i32_1 = arith.constant 0 : i32
    return %arg1, %c0_i32, %c0_i32_0 : i32, i32, i32
  }
  func.func @transform_7(%arg0: i32, %arg1: i32) -> (i32, i32, i32) {
    %c0_i32 = arith.constant 0 : i32
    %c0_i32_0 = arith.constant 0 : i32
    %c0_i32_1 = arith.constant 0 : i32
    return %arg1, %c0_i32, %c0_i32_0 : i32, i32, i32
  }
  func.func @transform_8(%arg0: i32, %arg1: i32) -> (i32, i32, i32) {
    %c0_i32 = arith.constant 0 : i32
    %c0_i32_0 = arith.constant 0 : i32
    %c0_i32_1 = arith.constant 0 : i32
    return %arg1, %c0_i32, %c0_i32_0 : i32, i32, i32
  }
  func.func @transform_9(%arg0: i32, %arg1: i32) -> (i32, i32, i32) {
    %c0_i32 = arith.constant 0 : i32
    %c0_i32_0 = arith.constant 0 : i32
    %c0_i32_1 = arith.constant 0 : i32
    return %arg1, %c0_i32, %c0_i32_0 : i32, i32, i32
  }
  func.func @transform_10(%arg0: i32, %arg1: i32) -> (i32, i32, i32) {
    %c0_i32 = arith.constant 0 : i32
    %c0_i32_0 = arith.constant 0 : i32
    %c0_i32_1 = arith.constant 0 : i32
    return %arg1, %c0_i32, %c0_i32_0 : i32, i32, i32
  }
  func.func @transform_11(%arg0: i32, %arg1: i32) -> (i32, i32, i32) {
    %c0_i32 = arith.constant 0 : i32
    %c0_i32_0 = arith.constant 0 : i32
    %c0_i32_1 = arith.constant 0 : i32
    return %arg1, %c0_i32, %c0_i32_0 : i32, i32, i32
  }
  func.func @transform_12(%arg0: i32, %arg1: i32) -> (i32, i32, i32) {
    %c0_i32 = arith.constant 0 : i32
    %c0_i32_0 = arith.constant 0 : i32
    %c0_i32_1 = arith.constant 0 : i32
    return %arg1, %c0_i32, %c0_i32_0 : i32, i32, i32
  }
  func.func @transform_13(%arg0: i32, %arg1: i32) -> (i32, i32, i32) {
    %c0_i32 = arith.constant 0 : i32
    %c0_i32_0 = arith.constant 0 : i32
    %c0_i32_1 = arith.constant 0 : i32
    return %arg0, %c0_i32, %c0_i32_0 : i32, i32, i32
  }
}

</mosaic_0001>

<bundles_post_ra>
// kernel: tpu_custom_call.1
= control target key start
LH: loop header
LB: loop body
LE: loop exit
PB: predicated region body
PF: predicated region fallthrough
CT: control target
= control target key end

     0   :  { %s3192_s0 = inlined_call_operand.vmem [shape: f32[2,8,32], index: 0, kind: input, shape index: {}]   ;;  %s3193_s1 = inlined_call_operand.vmem [shape: bf16[2,32,96], index: 1, kind: input, shape index: {}]   ;;  %s3194_s2 = inlined_call_operand.vmem [shape: f32[2,1,96], index: 2, kind: input, shape index: {}]   ;;  %s3195_s3 = inlined_call_operand.vmem [shape: bf16[2,32,32], index: 3, kind: input, shape index: {}]   ;;  %s3196_s4 = inlined_call_operand.vmem [shape: f32[2,1,32], index: 4, kind: input, shape index: {}]   ;;  %s3197_s5 = inlined_call_operand.vmem [shape: f32[2,1,32], index: 5, kind: input, shape index: {}]   ;;  %s3198_s6 = inlined_call_operand.vmem [shape: f32[2,1,32], index: 6, kind: input, shape index: {}]   ;;  %s3199_s7 = inlined_call_operand.vmem [shape: bf16[2,32,128], index: 7, kind: input, shape index: {}]   ;;  %s3200_s8 = inlined_call_operand.vmem [shape: f32[2,1,128], index: 8, kind: input, shape index: {}]   ;;  %s3201_s9 = inlined_call_operand.vmem [shape: bf16[2,128,32], index: 9, kind: input, shape index: {}]   ;;  %s3202_s10 = inlined_call_operand.vmem [shape: f32[2,1,32], index: 10, kind: input, shape index: {}]   ;;  %s3203_s11 = inlined_call_operand.vmem [shape: f32[2,1,32], index: 11, kind: input, shape index: {}]   ;;  %s3204_s12 = inlined_call_operand.vmem [shape: f32[2,1,32], index: 12, kind: input, shape index: {}]   ;;  %s3205_s13 = inlined_call_operand.hbm [shape: f32[2,8,32], index: 13, kind: output, shape index: {}]  }
   0x1   :  { %3221 = sst [smem:[#allocation18_spill]] %s3192_s0 }
   0x2   :  { %3222 = sst [smem:[#allocation19_spill]] %s3193_s1 }
   0x3   :  { %3223 = sst [smem:[#allocation20_spill]] %s3195_s3 }
   0x4   :  { %3224 = sst [smem:[#allocation21_spill]] %s3199_s7 }
   0x5   :  { %3225 = sst [smem:[#allocation22_spill]] %s3204_s12 }
   0x6   :  { %3226 = sst [smem:[#allocation23_spill]] %s3205_s13 }
   0x7   :  { %18 = vsyncpa [#allocation3], 0 }
   0x8   :  { %20 = vsyncpa [#allocation3 + $0x1], 0  ;;  %s2746_s25 = smov 0   ;;  %s2748_s26 = smov 0  }
   0x9   :  { %s2750_s27 = smov 0   ;;  %s2752_s28 = smov 0  }
   0xa   :  { %s2754_s29 = smov 0   ;;  %s2756_s30 = smov 0  }
   0xb   :  { %s2758_s14 = smov 0   ;;  %s2760_s15 = smov 0  }
   0xc LB: > { %3227 = sst [smem:[#allocation5_spill]] %s2633_s25  ;;  %s2259_s16 = sadd.s32 4294967295, %s2661_s15   ;;  %s2661_s15 = sphi %s2760_s15, %s26_s15   ;;  %s2657_s14 = sphi %s2758_s14, %s3268_s14   ;;  %s2653_s30 = sphi %s2756_s30, %s3267_s30   ;;  %s2649_s29 = sphi %s2754_s29, %s3266_s29   ;;  %s2645_s28 = sphi %s2752_s28, %s3265_s28   ;;  %s2641_s27 = sphi %s2750_s27, %s3264_s27   ;;  %s2637_s26 = sphi %s2748_s26, %s3263_s26   ;;  %s2633_s25 = sphi %s2746_s25, %s3262_s25  }
   0xd   : > { %3228 = sst [smem:[#allocation6_spill]] %s2637_s26  ;;  %s2260_s17 = sadd.s32 4294967294, %s2661_s15  }
   0xe   : > { %3229 = sst [smem:[#allocation7_spill]] %s2641_s27  ;;  %s35_s18 = sadd.s32 1, %s2653_s30 }
   0xf   : > { %3230 = sst [smem:[#allocation8_spill]] %s2645_s28  ;;  %p36_p0 = scmp.ge.s32.totalorder %s35_s18, 2 }
  0x10   : > { %3231 = sst [smem:[#allocation9_spill]] %s2649_s29  ;;  %s38_s19 = sadd.s32 1, %s2657_s14 }
  0x11   : > { %3232 = sst [smem:[#allocation10_spill]] %s2653_s30  ;;  %p393_p1 = scmp.ne.s32.totalorder %s2641_s27, %s2637_s26 }
  0x12   : > { %3233 = sst [smem:[#allocation11_spill]] %s2657_s14  ;;  %p394_p2 = scmp.eq.s32.totalorder %s2259_s16, 3 }
  0x13   : > { %3234 = sst [smem:[#allocation12_spill]] %s2661_s15  ;;  %s3270_s18 = smov (%p36_p0, %s35_s18), 0 }
  0x14   : > { %3235 = sst [smem:[#allocation13_spill]] %s3270_s18  ;;  %s3272_s19 = smov (!%p36_p0, %s38_s19), %s2657_s14 }
  0x15   : > { %p2795_p3 = por %p394_p2, %p393_p1  ;;  %p399_p4 = scmp.ne.s32.totalorder %s2637_s26, %s2633_s25 }
  0x16   : > { %p40_p5 = scmp.ge.s32.totalorder %s3272_s19, 2  ;;  %p400_p6 = scmp.eq.s32.totalorder %s2260_s17, 3 }
  0x17   : > { %s3236_s20 = scalar_select %p2795_p3, 1, 0 }
  0x18   : > { %p2263_p7 = scmp.ge.s32.totalorder %s2661_s15, 1  ;;  %p505_p8 = scmp.lt.s32.totalorder %s2661_s15, 5 }
  0x19   : > { %3237 = sst [smem:[#allocation14_spill]] %s3236_s20  ;;  %s3274_s19 = smov (%p40_p5, %s3272_s19), 0 }
  0x1a   : > { %3238 = sst [smem:[#allocation15_spill]] %s3274_s19  ;;  %p2805_p9 = por %p400_p6, %p399_p4 }
  0x1b   : > { %p506_p10 = pnand %p2263_p7, %p505_p8  ;;  %s380_s22 = ssub.s32 %s2657_s14, %s3274_s19 }
  0x1c   : > { %s3239_s21 = scalar_select %p2805_p9, 1, 0 }
  0x1d   : > { %s383_s23 = sadd.s32 1, %s2641_s27  ;;  %p381_p11 = scmp.eq.s32.totalorder %s380_s22, 0 }
  0x1e   : > { %3240 = sst [smem:[#allocation16_spill]] %s3239_s21  ;;  %509 = sbr.rel (%p506_p10) target bundleno = 2780 (0xadc), region = 72 }
  0x1f   : > { %s2813_s24 = scalar_select %p381_p11, %s2641_s27, %s383_s23  }
  0x20   : > { %s3209_s16 = sand.u32 (!%p506_p10), 1, %s2637_s26   ;;  %p592_p12 = scmp.lt.s32.totalorder (!%p506_p10), %s2649_s29, 1 }
  0x21   : > { %3241 = sst [smem:[#allocation17_spill]] %s2813_s24  ;;  %s2264_s17 = sshll.u32 (!%p506_p10), %s3209_s16, 3 }
  0x22   : > { %p596_p13 = scmp.lt.s32.totalorder (!%p506_p10), %s2645_s28, 1  ;;  %s3242_s0 = sld [smem:[#allocation18_spill]] (!%p506_p10) }
  0x23   : > { %s3243_s1 = sld [smem:[#allocation19_spill]] (!%p506_p10)  ;;  %s3244_s3 = sld [smem:[#allocation20_spill]] (!%p506_p10) }
  0x24   : > { %s3245_s7 = sld [smem:[#allocation21_spill]] (!%p506_p10)  ;;  %s3246_s24 = sld [smem:[#allocation22_spill]] (!%p506_p10) }
  0x25   : > { %s593_s18 = scalar_select %p592_p12, %s2649_s29, 1 }
  0x26   : > { %s2822_s30 = scalar_select %p596_p13, %s2645_s28, 1 }
  0x27   : > { %s2265_s22 = sshll.u32 %s593_s18, 3  ;;  %s2879_s26 = scalar_lea.vmem [#allocation2], %s2264_s17 }
  0x28   : > { %s595_s14 = scalar_lea.vmem %s3242_s0, %s2265_s22  ;;  %s2320_s16 = sshll.u32 %s2822_s30, 4 }
  0x29   : > { %s600_s21 = scalar_lea.vmem %s3243_s1, %s2320_s16  ;;  %s2838_s29 = scalar_lea.vmem %s3244_s3, %s2320_s16 }
  0x2a   : > { %s2855_s15 = scalar_lea.vmem %s3245_s7, %s2320_s16  ;;  %s625_s13 = scalar_lea.vmem %s3200_s8, %s2822_s30 }
  0x2b   : > { %s2323_s3 = sshll.u32 %s2822_s30, 6  ;;  %s633_s12 = scalar_lea.vmem %s3202_s10, %s2822_s30 }
  0x2c   : > { %s2869_s23 = scalar_lea.vmem %s3201_s9, %s2323_s3  ;;  %s636_s1 = scalar_lea.vmem %s3203_s11, %s2822_s30 }
  0x2d   : > { %s639_s7 = scalar_lea.vmem %s3246_s24, %s2822_s30  ;;  %s3247_s20 = sld [smem:[#allocation8_spill]] }
  0x33   : > { %p2274_p0 = scmp.ne.s32.totalorder %s3247_s20, 0 }
  0x34   : > { %v645_v0 = vld [vmem:[%s595_s14] sm:$0xff] (!%p2274_p0)  ;;  %vm646_vm0 = vcmask (!%p2274_p0), 261120  }
  0x35   : > { %644 = sbr.rel (%p2274_p0) target bundleno = 60 (0x3c), region = 76  ;;  %647 = vst.msk [vmem:[%s2879_s26] sm:$0xff] (!%p2274_p0), %vm646_vm0, %v645_v0 }
  0x3c PF: > { %v2533_v1 = vld [vmem:[%s600_s21] sm:$0xff]   ;;  %v2663_v2 = vmov 0.0   ;;  %v2534_v3 = vld [vmem:[%s600_s21 + $0x8] sm:$0xff]   ;;  %vm2664_vm1 = vmmov 0   ;;  %vm673_vm2 = vcmask 261120   ;;  %s3248_s21 = scalar_lea.vmem %s3194_s2, %s2822_s30  ;;  %s2665_s17 = smov 104   ;;  %v732_v17 = vlaneseq }
  0x3d   : > { %2358 = vmatprep.subr.bf16.mxu0 %v2663_v2  ;;  %2378 = vmatprep.subr.bf16.mxu1 %v2663_v2  ;;  %v2888_v4 = vld [vmem:[%s2879_s26] sm:$0xff]  ;;  %s2666_s24 = smov 120   ;;  %s2667_s28 = smov 96   ;;  %v2669_v15 = vmov 1983009808   ;;  %vm1167_vm3 = vcmask 64512  }
  0x3e   : > { %2359 = vmatpush3.bf16.msra.mxu0 %v2533_v1  ;;  %2362 = vmatprep.mubr.msk.bf16.mxu0 %vm2664_vm1, %v2663_v2  ;;  %v649_v5 = vpack.c.bf16 %v2888_v4, %v2888_v4  ;;  %v2275_v6 = vld [vmem:[%s3248_s21] ss:$0 sm:$0xff]  ;;  %s2668_s18 = smov 112   ;;  %v730_v16 = vunpack.c.l.s4 %v2669_v15  ;;  %v733_v19 = vshrl.u32 %v732_v17, 7  ;;  %v2670_v20 = vmov 1934713408   ;;  %s3249_s25 = scalar_lea.vmem %s3196_s4, %s2822_s30 }
  0x3f   : > { %2360 = vmatprep.subr.bf16.mxu0 %v2663_v2  ;;  %2380 = vmatprep.mubr.msk.bf16.mxu1 %vm2664_vm1, %v2663_v2  ;;  %v762_v21 = vunpack.c.l.s4 %v2670_v20  ;;  %s2671_s19 = smov 64   ;;  %vm1411_vm4 = vcmask 1043456   ;;  %s2673_s22 = smov 8   ;;  %vm1742_vm5 = vcmask 130048   ;;  %vm1744_vm6 = vcmask 195584  }
  0x40   : > { %v731_v18 = vunpack.c.0.s8 %v730_v16  ;;  %s2674_s0 = smov 24   ;;  %s3250_s3 = scalar_lea.vmem %s3197_s5, %s2822_s30 }
  0x41   : > { %v763_v27 = vunpack.c.0.s8 %v762_v21  ;;  %s3256_s14 = sld [smem:[#allocation23_spill]] }
  0x42   : > { %2361 = vmatpush3.bf16.msra.mxu0 %v2534_v3  ;;  %v2923_v24 = vsub.s32 %v731_v18, %v733_v19 }
  0x43   : > { %2366 = vmatprep.subr.bf16.mxu0 %v2663_v2  ;;  %v2933_v34 = vsub.s32 %v763_v27, %v733_v19 }
  0x45   : > { %2363 = vmatmul.mubr.msk.bf16.vlgmr.msra.gmra.mrb[0].mxu0 %vm673_vm2, %v649_v5 }
  0x46   : > { %2368 = vmatprep.mubr.msk.bf16.mxu0 %vm2664_vm1, %v2663_v2 }
  0x47   : > { %s3257_s21 = smov %s3256_s14 }
 0x118   : > { %v711_v7 = vpop.f32.mrb[0].mxu0 }
 0x119   : > { %v2904_v8 = vadd.f32 %v2275_v6, %v711_v7  ;;  %v2364_v9 = vpop.f32.mrb[1].mxu0 }
 0x11a   : > { %v714_v10 = vpop.f32.mrb[2].mxu0 }
 0x11b   : > { %724 = vrot.lane.b32.xlu1 %v2904_v8, %s2665_s17  ;;  %718 = vrot.lane.b32.xlu0 %v2904_v8, %s2666_s24  ;;  %v2365_v11 = vpop.f32.mrb[3].mxu0  ;;  %s3251_s17 = scalar_lea.vmem %s3198_s6, %s2822_s30 }
 0x11f   : > { %863 = vrot.lane.b32.xlu1 %v2904_v8, %s2667_s28  ;;  %721 = vrot.lane.b32.xlu0 %v2904_v8, %s2668_s18 }
 0x18d   : > { %v2910_v12 = vpop.permute.xlu0 %718  ;;  %v2913_v13 = vpop.permute.xlu1 %724 }
 0x18e   : > { %865 = vrot.lane.b32.xlu0 %v2910_v12, %s2667_s28  ;;  %v743_v25 = vcombine.low %v2910_v12, %v2913_v13  ;;  %v744_v26 = vcombine.high %v2910_v12, %v2913_v13 }
 0x190   : > { %v751_v30 = vrot.slane %v743_v25, %v2923_v24  ;;  %v758_v31 = vrot.slane %v744_v26, %v2923_v24 }
 0x191   : > { %v2915_v14 = vpop.permute.xlu0 %721  ;;  %v864_v32 = vpop.permute.xlu1 %863 }
 0x192   : > { %869 = vrot.lane.b32.xlu0 %v2913_v13, %s2667_s28  ;;  %867 = vrot.lane.b32.xlu1 %v2915_v14, %s2667_s28  ;;  %v727_v22 = vcombine.low %v2904_v8, %v2915_v14  ;;  %v728_v23 = vcombine.high %v2904_v8, %v2915_v14 }
 0x194   : > { %v735_v28 = vrot.slane %v727_v22, %v2923_v24  ;;  %v742_v29 = vrot.slane %v728_v23, %v2923_v24 }
 0x196   : > { %v759_v35 = vcombine.low %v735_v28, %v751_v30  ;;  %v760_v36 = vcombine.high %v735_v28, %v751_v30  ;;  %v775_v37 = vcombine.low %v742_v29, %v758_v31  ;;  %v776_v38 = vcombine.high %v742_v29, %v758_v31 }
 0x198   : > { %v767_v45 = vrot.slane %v759_v35, %v2933_v34  ;;  %v774_v46 = vrot.slane %v760_v36, %v2933_v34  ;;  %v783_v47 = vrot.slane %v775_v37, %v2933_v34  ;;  %v790_v48 = vrot.slane %v776_v38, %v2933_v34 }
 0x19a   : > { %v795_v57 = vcombine.low %v767_v45, %v774_v46  ;;  %v2279_v58 = vcombine.high %v767_v45, %v774_v46  ;;  %v811_v59 = vcombine.low %v783_v47, %v790_v48  ;;  %v2280_v60 = vcombine.high %v783_v47, %v790_v48 }
 0x19c   : > { %v802_v7 = vrot.slane %v795_v57, %v2923_v24  ;;  %v810_v9 = vrot.slane %v2279_v58, %v2923_v24  ;;  %v818_v10 = vrot.slane %v811_v59, %v2923_v24  ;;  %v826_v11 = vrot.slane %v2280_v60, %v2923_v24 }
 0x19e   : > { %v827_v23 = vcombine.low %v802_v7, %v810_v9  ;;  %v843_v25 = vcombine.low %v818_v10, %v826_v11  ;;  %v828_v26 = vcombine.high %v802_v7, %v810_v9  ;;  %v844_v27 = vcombine.high %v818_v10, %v826_v11 }
 0x1a0   : > { %v835_v35 = vrot.slane %v827_v23, %v2933_v34  ;;  %v851_v36 = vrot.slane %v843_v25, %v2933_v34 }
 0x200   : > { %v866_v33 = vpop.permute.xlu0 %865 }
 0x204   : > { %v868_v39 = vpop.permute.xlu1 %867  ;;  %v870_v40 = vpop.permute.xlu0 %869 }
 0x205   : > { %v875_v41 = vcombine.low %v864_v32, %v868_v39  ;;  %v876_v42 = vcombine.high %v864_v32, %v868_v39  ;;  %v891_v43 = vcombine.low %v866_v33, %v870_v40  ;;  %v892_v44 = vcombine.high %v866_v33, %v870_v40 }
 0x206   : > { %v842_v39 = vrot.slane %v828_v26, %v2933_v34  ;;  %v858_v40 = vrot.slane %v844_v27, %v2933_v34 }
 0x207   : > { %v883_v49 = vrot.slane %v875_v41, %v2923_v24  ;;  %v890_v50 = vrot.slane %v876_v42, %v2923_v24  ;;  %v899_v51 = vrot.slane %v891_v43, %v2923_v24  ;;  %v906_v52 = vrot.slane %v892_v44, %v2923_v24 }
 0x208   : > { %v859_v44 = vcombine.low %v835_v35, %v851_v36  ;;  %v861_v45 = vcombine.low %v842_v39, %v858_v40 }
 0x209   : > { %v907_v53 = vcombine.low %v883_v49, %v899_v51  ;;  %v908_v54 = vcombine.high %v883_v49, %v899_v51  ;;  %v923_v55 = vcombine.low %v890_v50, %v906_v52  ;;  %v924_v56 = vcombine.high %v890_v50, %v906_v52 }
 0x20a   : > { %v1159_v47 = vpack.c.bf16 %v859_v44, %v859_v44  ;;  %v1161_v48 = vpack.c.bf16 %v861_v45, %v861_v45  ;;  %v860_v51 = vcombine.high %v835_v35, %v851_v36 }
 0x20b   : > { %v915_v61 = vrot.slane %v907_v53, %v2933_v34  ;;  %v922_v62 = vrot.slane %v908_v54, %v2933_v34  ;;  %v931_v63 = vrot.slane %v923_v55, %v2933_v34  ;;  %v938_v0 = vrot.slane %v924_v56, %v2933_v34 }
 0x20c   : > { %v1160_v53 = vpack.c.bf16 %v860_v51, %v860_v51  ;;  %v862_v55 = vcombine.high %v842_v39, %v858_v40 }
 0x20d   : > { %v943_v1 = vcombine.low %v915_v61, %v922_v62  ;;  %v2281_v3 = vcombine.high %v915_v61, %v922_v62  ;;  %v959_v5 = vcombine.low %v931_v63, %v938_v0  ;;  %v2282_v6 = vcombine.high %v931_v63, %v938_v0 }
 0x20e   : > { %v1162_v56 = vpack.c.bf16 %v862_v55, %v862_v55 }
 0x20f   : > { %v950_v15 = vrot.slane %v943_v1, %v2923_v24  ;;  %v958_v16 = vrot.slane %v2281_v3, %v2923_v24  ;;  %v966_v17 = vrot.slane %v959_v5, %v2923_v24  ;;  %v974_v18 = vrot.slane %v2282_v6, %v2923_v24 }
 0x211   : > { %v975_v19 = vcombine.low %v950_v15, %v958_v16  ;;  %v991_v20 = vcombine.low %v966_v17, %v974_v18  ;;  %v976_v21 = vcombine.high %v950_v15, %v958_v16  ;;  %v992_v22 = vcombine.high %v966_v17, %v974_v18 }
 0x213   : > { %v983_v28 = vrot.slane %v975_v19, %v2933_v34  ;;  %v999_v29 = vrot.slane %v991_v20, %v2933_v34  ;;  %v990_v30 = vrot.slane %v976_v21, %v2933_v34  ;;  %v1006_v31 = vrot.slane %v992_v22, %v2933_v34 }
 0x215   : > { %v1007_v32 = vcombine.low %v983_v28, %v999_v29  ;;  %v1009_v33 = vcombine.low %v990_v30, %v1006_v31  ;;  %v1008_v43 = vcombine.high %v983_v28, %v999_v29  ;;  %v1010_v50 = vcombine.high %v990_v30, %v1006_v31 }
 0x217   : > { %v1163_v37 = vpack.c.bf16 %v1007_v32, %v1007_v32  ;;  %v1165_v38 = vpack.c.bf16 %v1009_v33, %v1009_v33  ;;  %v1164_v46 = vpack.c.bf16 %v1008_v43, %v1008_v43  ;;  %v1166_v52 = vpack.c.bf16 %v1010_v50, %v1010_v50 }
 0x219   : > { %v1172_v41 = vsel %vm1167_vm3, %v1163_v37, 0  ;;  %v1264_v42 = vsel %vm1167_vm3, %v1165_v38, 0  ;;  %v1218_v49 = vsel %vm1167_vm3, %v1164_v46, 0  ;;  %v1310_v54 = vsel %vm1167_vm3, %v1166_v52, 0 }
 0x21a   : > { %2367 = vmatpush3.bf16.xpose.msra.mxu0 %v1172_v41  ;;  %2379 = vmatpush3.bf16.xpose.msra.mxu1 %v1264_v42 }
 0x21b   : > { %2372 = vmatprep.subr.bf16.mxu0 %v2663_v2  ;;  %2390 = vmatprep.subr.bf16.mxu1 %v2663_v2 }
 0x221   : > { %2369 = vmatmul.mubr.msk.bf16.vlgmr.msra.gmra.mrb[4].mxu0 %vm1167_vm3, %v1159_v47  ;;  %2381 = vmatmul.mubr.msk.bf16.vlgmr.msra.gmra.mrb[0].mxu1 %vm1167_vm3, %v1161_v48 }
 0x222   : > { %2373 = vmatpush3.bf16.xpose.msra.mxu0 %v1218_v49  ;;  %2374 = vmatprep.mubr.msk.bf16.mxu0 %vm2664_vm1, %v2663_v2 }
 0x223   : > { %2384 = vmatprep.subr.bf16.mxu0 %v2663_v2  ;;  %2392 = vmatprep.mubr.msk.bf16.mxu1 %vm2664_vm1, %v2663_v2 }
 0x229   : > { %2375 = vmatmul.mubr.msk.bf16.vlgmr.msra.gmra.mrb[8].mxu0 %vm1167_vm3, %v1160_v53 }
 0x22a   : > { %2385 = vmatpush3.bf16.xpose.msra.mxu0 %v1310_v54  ;;  %2386 = vmatprep.mubr.msk.bf16.mxu0 %vm2664_vm1, %v2663_v2 }
 0x22b   : > { %2396 = vmatprep.subr.bf16.mxu0 %v2663_v2 }
 0x231   : > { %2387 = vmatmul.mubr.msk.bf16.vlgmr.msra.gmra.mrb[12].mxu0 %vm1167_vm3, %v1162_v56 }
 0x232   : > { %2398 = vmatprep.mubr.msk.bf16.mxu0 %vm2664_vm1, %v2663_v2 }
 0x2f4   : > { %v1208_v57 = vpop.f32.mrb[4].mxu0  ;;  %v1300_v58 = vpop.f32.mrb[0].mxu1 }
 0x2f5   : > { %v1352_v59 = vmul.f32 0.35355338, %v1208_v57  ;;  %v1354_v60 = vmul.f32 0.35355338, %v1300_v58  ;;  %v2370_v61 = vpop.f32.mrb[5].mxu0  ;;  %v2382_v62 = vpop.f32.mrb[1].mxu1 }
 0x2f6   : > { %v1211_v63 = vpop.f32.mrb[6].mxu0  ;;  %v1303_v0 = vpop.f32.mrb[2].mxu1 }
 0x2f7   : > { %v2371_v1 = vpop.f32.mrb[7].mxu0  ;;  %v2383_v3 = vpop.f32.mrb[3].mxu1  ;;  %v1362_v5 = vsel %vm1167_vm3, %v1354_v60, -inf  ;;  %v1356_v6 = vsel %vm1167_vm3, %v1352_v59, -inf }
 0x2f8   : > { %1363 = vmax.xlane.f32.xlu0 %v1362_v5  ;;  %1357 = vmax.xlane.f32.xlu1 %v1356_v6 }
 0x2fc   : > { %v1254_v7 = vpop.f32.mrb[8].mxu0 }
 0x2fd   : > { %v1353_v9 = vmul.f32 0.35355338, %v1254_v7  ;;  %v2376_v10 = vpop.f32.mrb[9].mxu0 }
 0x2fe   : > { %v1257_v11 = vpop.f32.mrb[10].mxu0 }
 0x2ff   : > { %v2377_v15 = vpop.f32.mrb[11].mxu0  ;;  %v1359_v16 = vsel %vm1167_vm3, %v1353_v9, -inf }
 0x300   : > { %1360 = vmax.xlane.f32.xlu0 %v1359_v16 }
 0x304   : > { %v1346_v17 = vpop.f32.mrb[12].mxu0 }
 0x305   : > { %v1355_v18 = vmul.f32 0.35355338, %v1346_v17  ;;  %v2388_v19 = vpop.f32.mrb[13].mxu0 }
 0x306   : > { %v1349_v20 = vpop.f32.mrb[14].mxu0 }
 0x307   : > { %v2389_v21 = vpop.f32.mrb[15].mxu0  ;;  %v1365_v22 = vsel %vm1167_vm3, %v1355_v18, -inf }
 0x308   : > { %1366 = vmax.xlane.f32.xlu1 %v1365_v22 }
 0x316   : > { %1011 = vrot.lane.b32.xlu0 %v2904_v8, %s2671_s19 }
 0x319   : > { %1013 = vrot.lane.b32.xlu1 %v2910_v12, %s2671_s19 }
 0x385   : > { %v1358_v23 = vpop.xlane.xlu1 %1357  ;;  %v1364_v27 = vpop.xlane.xlu0 %1363 }
 0x386   : > { %v1368_v25 = vsub.f32 %v1352_v59, %v1358_v23  ;;  %v1370_v37 = vsub.f32 %v1354_v60, %v1364_v27 }
 0x388   : > { %v1372_v26 = vmul.f32 1.442695, %v1368_v25  ;;  %v1376_v38 = vmul.f32 1.442695, %v1370_v37 }
 0x38a   : > { %2547 = vpow2.f32 %v1372_v26 }
 0x38d   : > { %v1361_v28 = vpop.xlane.xlu0 %1360 }
 0x38e   : > { %v1369_v29 = vsub.f32 %v1353_v9, %v1361_v28 }
 0x390   : > { %v1374_v30 = vmul.f32 1.442695, %v1369_v29 }
 0x392   : > { %2549 = vpow2.f32 %v1374_v30 }
 0x394   : > { %v2989_v31 = vpop.eup %2547 }
 0x395   : > { %v1380_v32 = vsel %vm1167_vm3, %v2989_v31, 0.0  ;;  %v1367_v12 = vpop.xlane.xlu1 %1366 }
 0x396   : > { %1381 = vadd.xlane.f32.xlu0 %v1380_v32  ;;  %v1371_v35 = vsub.f32 %v1355_v18, %v1367_v12 }
 0x398   : > { %v1378_v36 = vmul.f32 1.442695, %v1371_v35 }
 0x399   : > { %v1014_v43 = vpop.permute.xlu1 %1013 }
 0x39a   : > { %2551 = vpow2.f32 %v1378_v36 }
 0x39b   : > { %2553 = vpow2.f32 %v1376_v38 }
 0x39c   : > { %v2993_v33 = vpop.eup %2549 }
 0x39d   : > { %v1383_v8 = vsel %vm1167_vm3, %v2993_v33, 0.0 }
 0x39e   : > { %1384 = vadd.xlane.f32.xlu1 %v1383_v8 }
 0x3a4   : > { %v2999_v39 = vpop.eup %2551 }
 0x3a5   : > { %v1389_v40 = vsel %vm1167_vm3, %v2999_v39, 0.0  ;;  %v3003_v41 = vpop.eup %2553 }
 0x3ac   : > { %1017 = vrot.lane.b32.xlu0 %v2913_v13, %s2671_s19  ;;  %v1386_v13 = vsel %vm1167_vm3, %v3003_v41, 0.0 }
 0x3af   : > { %1015 = vrot.lane.b32.xlu1 %v2915_v14, %s2671_s19  ;;  %v1012_v14 = vpop.permute.xlu0 %1011 }
 0x3cb   : > { %1390 = vadd.xlane.f32.xlu0 %v1389_v40 }
 0x3d3   : > { %1387 = vadd.xlane.f32.xlu1 %v1386_v13 }
 0x423   : > { %v1382_v42 = vpop.xlane.xlu0 %1381 }
 0x424   : > { %2555 = vrcp.f32 %v1382_v42 }
 0x427   : > { %v1018_v44 = vpop.permute.xlu0 %1017 }
 0x428   : > { %v1039_v46 = vcombine.low %v1014_v43, %v1018_v44  ;;  %v1040_v47 = vcombine.high %v1014_v43, %v1018_v44 }
 0x42a   : > { %v1047_v51 = vrot.slane %v1039_v46, %v2923_v24  ;;  %v1054_v52 = vrot.slane %v1040_v47, %v2923_v24 }
 0x42b   : > { %v1385_v45 = vpop.xlane.xlu1 %1384 }
 0x42c   : > { %2557 = vrcp.f32 %v1385_v45 }
 0x42e   : > { %v2556_v17 = vpop.eup %2555 }
 0x42f   : > { %v1016_v48 = vpop.permute.xlu1 %1015  ;;  %v1396_v28 = vmul.f32 %v2556_v17, %v2989_v31 }
 0x430   : > { %v1023_v49 = vcombine.low %v1012_v14, %v1016_v48  ;;  %v1024_v50 = vcombine.high %v1012_v14, %v1016_v48 }
 0x431   : > { %v1400_v37 = vpack.c.bf16 %v1396_v28, %v1396_v28 }
 0x432   : > { %v1031_v53 = vrot.slane %v1023_v49, %v2923_v24  ;;  %v1038_v54 = vrot.slane %v1024_v50, %v2923_v24 }
 0x434   : > { %v1055_v55 = vcombine.low %v1031_v53, %v1047_v51  ;;  %v1056_v56 = vcombine.high %v1031_v53, %v1047_v51  ;;  %v1071_v57 = vcombine.low %v1038_v54, %v1054_v52  ;;  %v1072_v58 = vcombine.high %v1038_v54, %v1054_v52 }
 0x436   : > { %v1063_v59 = vrot.slane %v1055_v55, %v2933_v34  ;;  %v1070_v60 = vrot.slane %v1056_v56, %v2933_v34  ;;  %v1079_v61 = vrot.slane %v1071_v57, %v2933_v34  ;;  %v1086_v62 = vrot.slane %v1072_v58, %v2933_v34  ;;  %v2558_v22 = vpop.eup %2557 }
 0x437   : > { %v1397_v29 = vmul.f32 %v2558_v22, %v2993_v33 }
 0x438   : > { %v1091_v63 = vcombine.low %v1063_v59, %v1070_v60  ;;  %v2283_v0 = vcombine.high %v1063_v59, %v1070_v60  ;;  %v1107_v1 = vcombine.low %v1079_v61, %v1086_v62  ;;  %v2284_v3 = vcombine.high %v1079_v61, %v1086_v62 }
 0x439   : > { %v1401_v38 = vpack.c.bf16 %v1397_v29, %v1397_v29 }
 0x43a   : > { %v1098_v5 = vrot.slane %v1091_v63, %v2923_v24  ;;  %v1106_v6 = vrot.slane %v2283_v0, %v2923_v24  ;;  %v1114_v7 = vrot.slane %v1107_v1, %v2923_v24  ;;  %v1122_v9 = vrot.slane %v2284_v3, %v2923_v24 }
 0x43c   : > { %v1123_v10 = vcombine.low %v1098_v5, %v1106_v6  ;;  %v1139_v11 = vcombine.low %v1114_v7, %v1122_v9  ;;  %v1124_v15 = vcombine.high %v1098_v5, %v1106_v6  ;;  %v1140_v16 = vcombine.high %v1114_v7, %v1122_v9 }
 0x43e   : > { %v1131_v18 = vrot.slane %v1123_v10, %v2933_v34  ;;  %v1147_v19 = vrot.slane %v1139_v11, %v2933_v34  ;;  %v1138_v20 = vrot.slane %v1124_v15, %v2933_v34  ;;  %v1154_v21 = vrot.slane %v1140_v16, %v2933_v34  ;;  %v2535_v15 = vld [vmem:[%s2838_s29] sm:$0xff]  }
 0x440   : > { %v1155_v23 = vcombine.low %v1131_v18, %v1147_v19  ;;  %v1156_v25 = vcombine.high %v1131_v18, %v1147_v19  ;;  %v1157_v26 = vcombine.low %v1138_v20, %v1154_v21  ;;  %v1158_v27 = vcombine.high %v1138_v20, %v1154_v21 }
 0x442   : > { %v1404_v30 = vpack.c.bf16 %v1155_v23, %v1155_v23  ;;  %v1405_v32 = vpack.c.bf16 %v1156_v25, %v1156_v25  ;;  %v1406_v35 = vpack.c.bf16 %v1157_v26, %v1157_v26  ;;  %v1407_v36 = vpack.c.bf16 %v1158_v27, %v1158_v27  ;;  %v2536_v25 = vld [vmem:[%s2838_s29 + $0x8] sm:$0xff]   ;;  %s2672_s29 = smov 16  }
 0x444   : > { %v1413_v8 = vsel %vm1411_vm4, %v1404_v30, 0  ;;  %v1459_v12 = vsel %vm1411_vm4, %v1405_v32, 0  ;;  %v1505_v31 = vsel %vm1411_vm4, %v1406_v35, 0  ;;  %v1551_v33 = vsel %vm1411_vm4, %v1407_v36, 0 }
 0x445   : > { %2391 = vmatpush3.bf16.msra.mxu1 %v1413_v8  ;;  %2397 = vmatpush3.bf16.msra.mxu0 %v1459_v12 }
 0x446   : > { %2402 = vmatprep.subr.bf16.mxu1 %v2663_v2  ;;  %2408 = vmatprep.subr.bf16.mxu0 %v2663_v2 }
 0x448   : > { %2393 = vmatmul.mubr.msk.bf16.vlgmr.msra.gmra.mrb[4].mxu1 %vm1167_vm3, %v1400_v37  ;;  %2399 = vmatmul.mubr.msk.bf16.vlgmr.msra.gmra.mrb[16].mxu0 %vm1167_vm3, %v1401_v38 }
 0x449   : > { %2403 = vmatpush3.bf16.msra.mxu1 %v1505_v31  ;;  %2409 = vmatpush3.bf16.msra.mxu0 %v1551_v33 }
 0x44a   : > { %2410 = vmatprep.mubr.msk.bf16.mxu0 %vm2664_vm1, %v2663_v2  ;;  %2404 = vmatprep.mubr.msk.bf16.mxu1 %vm2664_vm1, %v2663_v2 }
 0x44b   : > { %2414 = vmatprep.subr.bf16.mxu1 %v2663_v2  ;;  %2422 = vmatprep.subr.bf16.mxu0 %v2663_v2 }
 0x458   : > { %v1391_v40 = vpop.xlane.xlu0 %1390 }
 0x459   : > { %2559 = vrcp.f32 %v1391_v40 }
 0x460   : > { %v1388_v13 = vpop.xlane.xlu1 %1387 }
 0x461   : > { %2561 = vrcp.f32 %v1388_v13 }
 0x463   : > { %v2560_v14 = vpop.eup %2559 }
 0x464   : > { %v1399_v42 = vmul.f32 %v2560_v14, %v2999_v39 }
 0x466   : > { %v1403_v43 = vpack.c.bf16 %v1399_v42, %v1399_v42 }
 0x468   : > { %2411 = vmatmul.mubr.msk.bf16.vlgmr.msra.gmra.mrb[20].mxu0 %vm1167_vm3, %v1403_v43 }
 0x469   : > { %2426 = vmatprep.mubr.msk.bf16.mxu0 %vm2664_vm1, %v2663_v2 }
 0x46b   : > { %v2562_v44 = vpop.eup %2561 }
 0x46c   : > { %v1398_v45 = vmul.f32 %v2562_v44, %v3003_v41 }
 0x46e   : > { %v1402_v46 = vpack.c.bf16 %v1398_v45, %v1398_v45 }
 0x470   : > { %2405 = vmatmul.mubr.msk.bf16.vlgmr.msra.gmra.mrb[8].mxu1 %vm1167_vm3, %v1402_v46  ;;  %v2295_v46 = vld [vmem:[%s3249_s25] ss:$0 sm:$0xff] }
 0x471   : > { %2418 = vmatprep.mubr.msk.bf16.mxu1 %vm2664_vm1, %v2663_v2  ;;  %2415 = vmatpush3.bf16.msra.mxu1 %v2535_v15 }
 0x472   : > { %2416 = vmatprep.subr.bf16.mxu1 %v2663_v2 }
 0x475   : > { %2417 = vmatpush3.bf16.msra.mxu1 %v2536_v25 }
 0x476   : > { %2430 = vmatprep.subr.bf16.mxu1 %v2663_v2 }
 0x51b   : > { %v1449_v47 = vpop.f32.mrb[4].mxu1  ;;  %v1495_v48 = vpop.f32.mrb[16].mxu0 }
 0x51c   : > { %v2394_v49 = vpop.f32.mrb[5].mxu1  ;;  %v2400_v50 = vpop.f32.mrb[17].mxu0 }
 0x51d   : > { %v1452_v39 = vpop.f32.mrb[6].mxu1  ;;  %v1498_v51 = vpop.f32.mrb[18].mxu0 }
 0x51e   : > { %v2395_v52 = vpop.f32.mrb[7].mxu1  ;;  %v2401_v53 = vpop.f32.mrb[19].mxu0 }
 0x53b   : > { %v1587_v54 = vpop.f32.mrb[20].mxu0 }
 0x53c   : > { %v1609_v55 = vcombine.low %v1495_v48, %v1587_v54  ;;  %v1610_v56 = vcombine.high %v1495_v48, %v1587_v54  ;;  %v2412_v57 = vpop.f32.mrb[21].mxu0 }
 0x53d   : > { %v1590_v58 = vpop.f32.mrb[22].mxu0 }
 0x53e   : > { %v2413_v41 = vpop.f32.mrb[23].mxu0  ;;  %v1617_v0 = vrot.slane %v1609_v55, %v2923_v24  ;;  %v1624_v1 = vrot.slane %v1610_v56, %v2923_v24  ;;  %v2537_v58 = vld [vmem:[%s2855_s15] sm:$0xff]  }
 0x53f   : > { %2423 = vmatpush3.bf16.msra.mxu0 %v2537_v58  ;;  %v2538_v41 = vld [vmem:[%s2855_s15 + $0x8] sm:$0xff]   ;;  %s2069_s15 = sshll.u32 %s2879_s26, 4  ;;  %s3137_s15 = int_to_ptr.vmem [resolvable:$true] %s2069_s15 }
 0x540   : > { %2424 = vmatprep.subr.bf16.mxu0 %v2663_v2  ;;  %s2567_s30 = scalar_lea.vmem %s3137_s15, 128 }
 0x541   : > { %p2568_p1 = scmp.ne.s32.totalorder %s3137_s15, %s2567_s30 }
 0x543   : > { %v1541_v59 = vpop.f32.mrb[8].mxu1  ;;  %2425 = vmatpush3.bf16.msra.mxu0 %v2538_v41  ;;  %p2569_p2 = pnand %p2568_p1, %p2795_p3 }
 0x544   : > { %v1593_v60 = vcombine.low %v1449_v47, %v1541_v59  ;;  %v1594_v61 = vcombine.high %v1449_v47, %v1541_v59  ;;  %v2406_v62 = vpop.f32.mrb[9].mxu1  ;;  %v2540_v59 = vld [vmem:[%s2869_s23 + $0x8] sm:$0xff]  }
 0x545   : > { %v1544_v63 = vpop.f32.mrb[10].mxu1  ;;  %v2543_v62 = vld [vmem:[%s2869_s23 + $0x20] sm:$0xff]   ;;  %p2570_p4 = pneg %p2569_p2 }
 0x546   : > { %v1601_v3 = vrot.slane %v1593_v60, %v2923_v24  ;;  %v1608_v5 = vrot.slane %v1594_v61, %v2923_v24  ;;  %v2407_v6 = vpop.f32.mrb[11].mxu1  ;;  %v2541_v60 = vld [vmem:[%s2869_s23 + $0x10] sm:$0xff]   ;;  %v2542_v61 = vld [vmem:[%s2869_s23 + $0x18] sm:$0xff]   ;;  %v2544_v63 = vld [vmem:[%s2869_s23 + $0x28] sm:$0xff]  }
 0x547   : > { %v2299_v6 = vld [vmem:[%s3250_s3] ss:$0 sm:$0xff] }
 0x548   : > { %v1625_v7 = vcombine.low %v1601_v3, %v1617_v0  ;;  %v1626_v9 = vcombine.high %v1601_v3, %v1617_v0  ;;  %v1641_v10 = vcombine.low %v1608_v5, %v1624_v1  ;;  %v1642_v11 = vcombine.high %v1608_v5, %v1624_v1 }
 0x54a   : > { %v1633_v16 = vrot.slane %v1625_v7, %v2933_v34  ;;  %v1640_v17 = vrot.slane %v1626_v9, %v2933_v34  ;;  %v1649_v18 = vrot.slane %v1641_v10, %v2933_v34  ;;  %v1656_v19 = vrot.slane %v1642_v11, %v2933_v34  ;;  %v2300_v9 = vld [vmem:[%s3251_s17] ss:$0 sm:$0xff] }
 0x54c   : > { %v1661_v20 = vcombine.low %v1633_v16, %v1640_v17  ;;  %v2293_v21 = vcombine.high %v1633_v16, %v1640_v17  ;;  %v1677_v22 = vcombine.low %v1649_v18, %v1656_v19  ;;  %v2294_v23 = vcombine.high %v1649_v18, %v1656_v19  ;;  %v2545_v16 = vld [vmem:[%s2869_s23 + $0x30] sm:$0xff]   ;;  %v2546_v17 = vld [vmem:[%s2869_s23 + $0x38] sm:$0xff]   ;;  %v2301_v18 = vld [vmem:[%s625_s13] ss:$0 sm:$0xff]  ;;  %s3252_s13 = sld [smem:[#allocation9_spill]] }
 0x54e   : > { %v1668_v26 = vrot.slane %v1661_v20, %v2923_v24  ;;  %v1676_v27 = vrot.slane %v2293_v21, %v2923_v24  ;;  %v1684_v28 = vrot.slane %v1677_v22, %v2923_v24  ;;  %v1692_v29 = vrot.slane %v2294_v23, %v2923_v24 }
 0x550   : > { %v1694_v30 = vcombine.high %v1668_v26, %v1676_v27  ;;  %v1710_v32 = vcombine.high %v1684_v28, %v1692_v29  ;;  %v1693_v8 = vcombine.low %v1668_v26, %v1676_v27  ;;  %v1709_v12 = vcombine.low %v1684_v28, %v1692_v29 }
 0x552   : > { %v1708_v35 = vrot.slane %v1694_v30, %v2933_v34  ;;  %v1724_v36 = vrot.slane %v1710_v32, %v2933_v34  ;;  %v1701_v37 = vrot.slane %v1693_v8, %v2933_v34  ;;  %v1717_v38 = vrot.slane %v1709_v12, %v2933_v34  ;;  %s2317_s25 = sshll.u32 %s3252_s13, 7 }
 0x553   : > { %s3135_s17 = scalar_lea.hbm %s3256_s14, %s2317_s25 }
 0x554   : > { %v1727_v31 = vcombine.low %v1708_v35, %v1724_v36  ;;  %v1726_v33 = vcombine.high %v1701_v37, %v1717_v38  ;;  %v1728_v40 = vcombine.high %v1708_v35, %v1724_v36  ;;  %v1725_v13 = vcombine.low %v1701_v37, %v1717_v38 }
 0x556   : > { %1734 = vrot.lane.b32.xlu1 %v1727_v31, %s2672_s29  ;;  %1730 = vrot.lane.b32.xlu0 %v1726_v33, %s2673_s22 }
 0x55a   : > { %1738 = vrot.lane.b32.xlu1 %v1728_v40, %s2674_s0 }
 0x5c8   : > { %v1735_v24 = vpop.permute.xlu1 %1734  ;;  %v1731_v14 = vpop.permute.xlu0 %1730 }
 0x5c9   : > { %v1741_v42 = vsel %vm1167_vm3, %v1725_v13, %v1731_v14  ;;  %v2314_v14 = vld [vmem:[%s636_s1] ss:$0 sm:$0xff] }
 0x5ca   : > { %v1743_v44 = vsel %vm1742_vm5, %v1741_v42, %v1735_v24 }
 0x5cc   : > { %v1739_v43 = vpop.permute.xlu1 %1738 }
 0x5cd   : > { %v1745_v34 = vsel %vm1744_vm6, %v1743_v44, %v1739_v43  ;;  %v2315_v43 = vld [vmem:[%s639_s7] ss:$0 sm:$0xff]  ;;  %s2675_s7 = smov [#allocation2]  }
 0x5ce   : > { %v1746_v45 = vpack.c.bf16 %v1745_v34, %v1745_v34  ;;  %s2571_s28 = sshll.u32 %s2675_s7, 4  ;;  %s2572_s28 = int_to_ptr.vmem [resolvable:$false] %s2571_s28 }
 0x5cf   : > { %s2573_s18 = scalar_lea.vmem %s2572_s28, 256  ;;  %p2574_p5 = scmp.lt.s32.totalorder %s3137_s15, %s2572_s28 }
 0x5d0   : > { %2419 = vmatmul.mubr.msk.bf16.vlgmr.msra.gmra.mrb[12].mxu1 %vm673_vm2, %v1746_v45  ;;  %p2575_p6 = scmp.lt.s32.totalorder %s2573_s18, %s2567_s30 }
 0x5d1   : > { %2446 = vmatprep.mubr.msk.bf16.mxu1 %vm2664_vm1, %v2663_v2 }
 0x5d2   : > { %p2576_p7 = por %p2575_p6, %p2574_p5 }
 0x5d4   : > { %p2577_p8 = pnand %p2576_p7, %p2570_p4 }
 0x6a3   : > { %v1807_v47 = vpop.f32.mrb[12].mxu1 }
 0x6a4   : > { %v1808_v48 = vadd.f32 %v2295_v46, %v1807_v47  ;;  %v2420_v49 = vpop.f32.mrb[13].mxu1 }
 0x6a5   : > { %v1810_v50 = vpop.f32.mrb[14].mxu1 }
 0x6a6   : > { %v2421_v39 = vpop.f32.mrb[15].mxu1  ;;  %v1813_v51 = vadd.f32 %v1808_v48, %v2888_v4  ;;  %v2539_v4 = vld [vmem:[%s2869_s23] sm:$0xff]  }
 0x6a7   : > { %2431 = vmatpush3.bf16.msra.mxu1 %v2539_v4 }
 0x6a8   : > { %v1814_v52 = vsel %vm673_vm2, %v1813_v51, 0.0  ;;  %2432 = vmatprep.subr.bf16.mxu1 %v2663_v2 }
 0x6a9   : > { %1815 = vadd.xlane.f32.xlu0 %v1814_v52 }
 0x6ab   : > { %2433 = vmatpush3.bf16.msra.mxu1 %v2540_v59 }
 0x6ac   : > { %2434 = vmatprep.subr.bf16.mxu1 %v2663_v2 }
 0x6af   : > { %2435 = vmatpush3.bf16.msra.mxu1 %v2541_v60 }
 0x6b0   : > { %2436 = vmatprep.subr.bf16.mxu1 %v2663_v2 }
 0x6b3   : > { %2437 = vmatpush3.bf16.msra.mxu1 %v2542_v61 }
 0x6b4   : > { %2438 = vmatprep.subr.bf16.mxu1 %v2663_v2 }
 0x6b7   : > { %2439 = vmatpush3.bf16.msra.mxu1 %v2543_v62 }
 0x6b8   : > { %2440 = vmatprep.subr.bf16.mxu1 %v2663_v2 }
 0x6bb   : > { %2441 = vmatpush3.bf16.msra.mxu1 %v2544_v63 }
 0x6bc   : > { %2442 = vmatprep.subr.bf16.mxu1 %v2663_v2 }
 0x6bf   : > { %2443 = vmatpush3.bf16.msra.mxu1 %v2545_v16 }
 0x6c0   : > { %2444 = vmatprep.subr.bf16.mxu1 %v2663_v2  ;;  %v2305_v2 = vld [vmem:[%s633_s12] ss:$0 sm:$0xff]  ;;  %s3253_s12 = sld [smem:[#allocation6_spill]] }
 0x6c3   : > { %2445 = vmatpush3.bf16.msra.mxu1 %v2546_v17 }
 0x6c6   : > { %s3258_s1 = sand.u32 1, %s3253_s12  }
 0x6c7   : > { %s2056_s24 = scalar_lea.sflag [#allocation3], %s3258_s1 }
 0x736   : > { %v1816_v53 = vpop.xlane.xlu0 %1815 }
 0x737   : > { %v1818_v54 = vmul.f32 0.03125, %v1816_v53 }
 0x739   : > { %v1819_v55 = vsub.f32 %v1813_v51, %v1818_v54 }
 0x73b   : > { %v1820_v56 = vmul.f32 %v1819_v55, %v1819_v55 }
 0x73d   : > { %v1821_v57 = vsel %vm673_vm2, %v1820_v56, 0.0 }
 0x73e   : > { %1822 = vadd.xlane.f32.xlu1 %v1821_v57 }
 0x7cb   : > { %v1823_v0 = vpop.xlane.xlu1 %1822 }
 0x7cc   : > { %v1824_v1 = vmul.f32 0.03125, %v1823_v0 }
 0x7ce   : > { %v1825_v3 = vadd.f32 1e-05, %v1824_v1 }
 0x7d0   : > { %2563 = vrsqrt.f32 %v1825_v3 }
 0x7da   : > { %v2564_v5 = vpop.eup %2563 }
 0x7db   : > { %v1827_v7 = vmul.f32 %v2564_v5, %v1819_v55 }
 0x7dd   : > { %v1835_v10 = vmul.f32 %v2299_v6, %v1827_v7 }
 0x7df   : > { %v1843_v11 = vadd.f32 %v2300_v9, %v1835_v10 }
 0x7e1   : > { %v1844_v15 = vpack.c.bf16 %v1843_v11, %v1843_v11 }
 0x7e3   : > { %2427 = vmatmul.mubr.msk.bf16.vlgmr.msra.gmra.mrb[24].mxu0 %vm673_vm2, %v1844_v15 }
 0x8b6   : > { %v1905_v19 = vpop.f32.mrb[24].mxu0 }
 0x8b7   : > { %v1906_v20 = vadd.f32 %v2301_v18, %v1905_v19  ;;  %v2428_v21 = vpop.f32.mrb[25].mxu0 }
 0x8b8   : > { %v1908_v22 = vpop.f32.mrb[26].mxu0 }
 0x8b9   : > { %v1911_v23 = vmax.f32 %v1906_v20, 0.0  ;;  %v2429_v25 = vpop.f32.mrb[27].mxu0 }
 0x8bb   : > { %v1912_v26 = vpack.c.bf16 %v1911_v23, %v1911_v23 }
 0x8bd   : > { %2447 = vmatmul.mubr.bf16.vlgmr.msra.gmra.mrb[16].mxu1 %v1912_v26 }
 0x990   : > { %v2018_v27 = vpop.f32.mrb[16].mxu1 }
 0x991   : > { %v2019_v28 = vadd.f32 %v2305_v2, %v2018_v27  ;;  %v2448_v29 = vpop.f32.mrb[17].mxu1 }
 0x992   : > { %v2021_v30 = vpop.f32.mrb[18].mxu1 }
 0x993   : > { %v2449_v32 = vpop.f32.mrb[19].mxu1  ;;  %v2024_v8 = vadd.f32 %v2019_v28, %v1843_v11 }
 0x995   : > { %v2025_v12 = vsel %vm673_vm2, %v2024_v8, 0.0 }
 0x996   : > { %2026 = vadd.xlane.f32.xlu0 %v2025_v12 }
 0xa23   : > { %v2027_v35 = vpop.xlane.xlu0 %2026 }
 0xa24   : > { %v2028_v36 = vmul.f32 0.03125, %v2027_v35 }
 0xa26   : > { %v2029_v37 = vsub.f32 %v2024_v8, %v2028_v36 }
 0xa28   : > { %v2030_v38 = vmul.f32 %v2029_v37, %v2029_v37 }
 0xa2a   : > { %v2031_v31 = vsel %vm673_vm2, %v2030_v38, 0.0 }
 0xa2b   : > { %2032 = vadd.xlane.f32.xlu0 %v2031_v31 }
 0xab8   : > { %v2033_v33 = vpop.xlane.xlu0 %2032 }
 0xab9   : > { %v2034_v40 = vmul.f32 0.03125, %v2033_v33 }
 0xabb   : > { %v2035_v13 = vadd.f32 1e-05, %v2034_v40 }
 0xabd   : > { %2565 = vrsqrt.f32 %v2035_v13 }
 0xac7   : > { %v2566_v24 = vpop.eup %2565 }
 0xac8   : > { %v2037_v42 = vmul.f32 %v2566_v24, %v2029_v37 }
 0xaca   : > { %v2045_v44 = vmul.f32 %v2314_v14, %v2037_v42 }
 0xacc   : > { %v2053_v34 = vadd.f32 %v2315_v43, %v2045_v44 }
 0xace   : > { %2054 = vst.msk [vmem:[%s2879_s26] sm:$0xff] %vm673_vm2, %v2053_v34 }
 0xacf   : > { %2580 = shalt.err (!%p2577_p8)
}
 0xad0   : > { %s2581_s26 = scalar_lea.hbm %s3135_s17, 128  ;;  %s2585_s12 = scalar_lea.hbm %s3257_s21, 256 }
 0xad1   : > { %p2582_p10 = scmp.ne.s32.totalorder %s3135_s17, %s2581_s26  ;;  %p2586_p13 = scmp.lt.u32.totalorder %s3135_s17, %s3257_s21 }
 0xad2   : > { %p2587_p0 = scmp.lt.u32.totalorder %s2585_s12, %s2581_s26  ;;  %p2589_p2 = scmp.lt.u32.totalorder %s2581_s26, %s3135_s17 }
 0xad3   : > { %p2583_p11 = pnand %p2582_p10, %p2795_p3 }
 0xad4   : > { %p2588_p1 = por %p2587_p0, %p2586_p13 }
 0xad5   : > { %p2584_p12 = pneg %p2583_p11 }
 0xad6   : > { %p2590_p4 = por %p2589_p2, %p2588_p1 }
 0xad8   : > { %p2591_p5 = pnand %p2590_p4, %p2584_p12 }
 0xada   : > { %2594 = shalt.err (!%p2591_p5)
}
 0xadb   : > { %2450 = dma.vmem_to_hbm [thread:$0]  (%p2795_p3), %s3137_s15, 128, %s3135_s17, %s2056_s24  }
 0xadc PF: > { %s3259_s0 = sld [smem:[#allocation12_spill]]  ;;  %s3260_s27 = sld [smem:[#allocation5_spill]] }
 0xae2   : > { %p2456_p6 = scmp.ge.s32.totalorder %s3259_s0, 2  ;;  %s2081_s25 = sand.u32 1, %s3260_s27  }
 0xae3   : > { %s2082_s20 = scalar_lea.sflag [#allocation3], %s2081_s25 }
 0xae4   : > { %p2453_p7 = pnand %p2456_p6, %p2805_p9 }
 0xae6   : > { %2628 = dma.done.wait (!%p2453_p7), %s2082_s20, 128  }
 0xae7   : > { %2630 = vsyncadd (!%p2453_p7), %s2082_s20, 4294967168  ;;  %s26_s15 = sadd.s32 1, %s3259_s0   ;;  %s3262_s25 = sld [smem:[#allocation6_spill]] }
 0xae8   : > { %p23_p8 = scmp.ge.s32.totalorder %s26_s15, 6   ;;  %s3263_s26 = sld [smem:[#allocation7_spill]] }
 0xae9   : > { %s3264_s27 = sld [smem:[#allocation17_spill]]  ;;  %s3265_s28 = sld [smem:[#allocation10_spill]] }
 0xaea   : > { %s3266_s29 = sld [smem:[#allocation11_spill]]  ;;  %s3267_s30 = sld [smem:[#allocation13_spill]] }
 0xaeb   : > { %s3268_s14 = sld [smem:[#allocation15_spill]]  ;;  %25 = sbr.rel (!%p23_p8) target bundleno = 12 (0xc), region = 147 }
 0xaf2   :  { %2087 = vsyncpa [#allocation3], 1 }
 0xaf3   :  { %2089 = vsyncpa [#allocation3 + $0x1], 1 }

</bundles_post_ra>
